<compile_context>
chip_gen: v7x
topology: tpu7x:2x2x1
jax: 0.10.0
libtpu: 0.0.40
codegen_flags: <defaults>
</compile_context>

<pallas_src>
import functools

import jax
import jax.numpy as jnp
from jax.experimental import pallas as pl
from jax.experimental.pallas import tpu as pltpu


def _round_up(x, m):
    return (x + m - 1) // m * m


def _pick_block_b(B):
    """Batch tile: largest power-of-two <= B (capped at 1024), 8-row aligned.

    Ragged B is handled by a cdiv grid with a masked tail tile.  When the whole
    batch would fit in a single grid step, halve the tile so v7x's two
    TensorCores both get work (harmless on single-TC v5e/v6e).
    """
    if B <= 8:
        return B                       # block == full dim is always legal
    bB = 8
    for cand in (1024, 512, 256, 128, 64, 32, 16):
        if cand <= B:
            bB = cand
            break
    if pl.cdiv(B, bB) < 2 and bB >= 16:
        bB //= 2                       # keep >= 2 grid steps for v7x megacore
    return bB


def _embeddings_kernel(x_ref, w_ref, b_ref, o_ref, *, act, res):
    # x_ref: [bB, T] (original token dtype), w_ref: [T, E_out], b_ref: [1, E_out] f32,
    # o_ref: [bB, E_out] (f32 or bf16).
    x = x_ref[...]
    w = w_ref[...]
    if x.dtype != w.dtype:
        if not jnp.issubdtype(x.dtype, jnp.floating):
            x = x.astype(jnp.float32)          # mirrors tokens.to(torch.float32)
        x = x.astype(w.dtype)
    y = jnp.dot(x, w, preferred_element_type=jnp.float32)
    y = y + b_ref[...].astype(jnp.float32)
    if res:
        # Exact ones column (torch.cat([ones, ebd])): force column 0 to 1.0
        # before the activation so 0*NaN / 0*Inf from the zero weight column
        # can never leak into it.
        col = jax.lax.broadcasted_iota(jnp.int32, y.shape, dimension=1)
        y = jnp.where(col == 0, 1.0, y)
    if act == "relu":
        y = jnp.maximum(y, 0.0)
    elif act == "tanh":
        # Intentional replication of the PyTorch code: Tanh is overwritten by Sigmoid.
        y = jax.nn.sigmoid(y)
    o_ref[...] = y.astype(o_ref.dtype)


def prepare_embeddings_params(weight, bias, *, res=0, compute_dtype=jnp.float32):
    """One-time parameter prep (hoisted out of the forward hot path).

    weight: [E, T] (PyTorch nn.Linear layout), bias: [E]
    Returns (w_aug [T, E_out], b_aug [1, E_out]) with an optional leading zero
    weight column / bias==1 for the fused `res` ones-column.
    """
    E, T = weight.shape
    w_t = jnp.asarray(weight, compute_dtype).T                   # [T, E]
    b = jnp.asarray(bias, jnp.float32)[None, :]                  # [1, E]
    if res:
        w_t = jnp.concatenate([jnp.zeros((T, 1), compute_dtype), w_t], axis=1)
        b = jnp.concatenate([jnp.ones((1, 1), jnp.float32), b], axis=1)
    return w_t, b


def embeddings_forward(tokens, w_aug, b_aug, *, act=None, res=0,
                       out_dtype=jnp.float32, block_b=None):
    """Forward pass of Embeddings.

    tokens: [B, T]   any float/int dtype (cast in-kernel)
    w_aug:  [T, E_out], b_aug: [1, E_out]  from prepare_embeddings_params
    out_dtype: jnp.float32 (matches torch) or jnp.bfloat16 to halve output HBM traffic.
    """
    B, T = tokens.shape
    Tw, E_out = w_aug.shape
    assert T == Tw, (T, Tw)
    assert b_aug.shape == (1, E_out), b_aug.shape

    bB = block_b if block_b is not None else _pick_block_b(B)
    assert bB % 8 == 0 or bB == B, bB
    grid_b = pl.cdiv(B, bB)            # ragged tail handled by masked stores

    # VMEM budget: double-buffered token/output tiles + resident weight/bias,
    # requested tightly (no over-asking on v7x's 64 MiB physical per-TC VMEM).
    x_bytes = jnp.dtype(tokens.dtype).itemsize
    w_bytes = jnp.dtype(w_aug.dtype).itemsize
    o_bytes = jnp.dtype(out_dtype).itemsize
    est = (2 * bB * T * x_bytes + 2 * bB * E_out * o_bytes
           + T * E_out * w_bytes + E_out * 4)
    vmem_limit = int(min(max(2 * est, 8 * 1024 * 1024), 32 * 1024 * 1024))

    kernel = functools.partial(_embeddings_kernel, act=act, res=res)

    out = pl.pallas_call(
        kernel,
        out_shape=jax.ShapeDtypeStruct((B, E_out), out_dtype),
        grid_spec=pltpu.PrefetchScalarGridSpec(
            num_scalar_prefetch=0,
            grid=(grid_b,),
            in_specs=[
                pl.BlockSpec((bB, T), lambda i: (i, 0)),        # token tiles stream
                pl.BlockSpec((T, E_out), lambda i: (0, 0)),     # weight resident
                pl.BlockSpec((1, E_out), lambda i: (0, 0)),     # bias resident
            ],
            out_specs=pl.BlockSpec((bB, E_out), lambda i: (i, 0)),
        ),
        compiler_params=pltpu.CompilerParams(
            dimension_semantics=("parallel",),    # megacore sharding on v7x
            vmem_limit_bytes=vmem_limit,
        ),
    )(tokens, w_aug, b_aug)
    return out


def init_embeddings_params(key, time_step, emb_size, initrange=0.01):
    # weight ~ Normal(0, initrange), bias = 0 (matches init_weights()); PyTorch layout [E, T].
    w = initrange * jax.random.normal(key, (emb_size, time_step), dtype=jnp.float32)
    b = jnp.zeros((emb_size,), dtype=jnp.float32)
    return w, b


def _reference(tokens, weight, bias, *, act=None, res=0):
    ebd = tokens.astype(jnp.float32) @ weight.astype(jnp.float32).T + bias[None, :]
    if res:
        ebd = jnp.concatenate([jnp.ones((ebd.shape[0], 1), ebd.dtype), ebd], axis=-1)
    if act == "relu":
        ebd = jnp.maximum(ebd, 0.0)
    elif act == "tanh":
        ebd = jax.nn.sigmoid(ebd)     # intentional: matches the PyTorch override
    return ebd


if __name__ == "__main__":
    # TODO(synk): the PyTorch forward's debug `print('ebd:', ebd.size())` and the
    # hard-coded `.cuda()` are host/device-side concerns with no kernel equivalent.
    key = jax.random.PRNGKey(0)
    k_w, k_x = jax.random.split(key)

    batch = 8
    time_step = 96       # default time_step of the module
    emb_size = 32

    weight, bias = init_embeddings_params(k_w, time_step, emb_size, initrange=0.01)
    tokens = jax.random.normal(k_x, (batch, time_step), dtype=jnp.float32)

    # 1) Default config: act=None, res=0 -> plain Linear projection, f32 out.
    w0, b0 = prepare_embeddings_params(weight, bias, res=0)
    out = jax.block_until_ready(embeddings_forward(tokens, w0, b0, act=None, res=0))
    ref = _reference(tokens, weight, bias, act=None, res=0)
    assert out.shape == (batch, emb_size)
    assert jnp.allclose(out, ref, atol=1e-5, rtol=1e-5)

    # 2) res=1 (fused, exact ones-column) + relu activation.
    w1, b1 = prepare_embeddings_params(weight, bias, res=1)
    out_r = jax.block_until_ready(embeddings_forward(tokens, w1, b1, act="relu", res=1))
    ref_r = _reference(tokens, weight, bias, act="relu", res=1)
    assert out_r.shape == (batch, emb_size + 1)
    assert jnp.allclose(out_r, ref_r, atol=1e-5, rtol=1e-5)
    assert jnp.allclose(out_r[:, 0], 1.0)          # ones column exact (relu(1)=1)

    # 3) act='tanh' (i.e. Sigmoid, replicating the PyTorch override) with res=1.
    out_s = jax.block_until_ready(embeddings_forward(tokens, w1, b1, act="tanh", res=1))
    ref_s = _reference(tokens, weight, bias, act="tanh", res=1)
    assert jnp.allclose(out_s, ref_s, atol=1e-5, rtol=1e-5)

    # 4) bf16 output (HBM-traffic option): f32 accumulation, cast only at store.
    out_bf = jax.block_until_ready(
        embeddings_forward(tokens, w0, b0, act=None, res=0, out_dtype=jnp.bfloat16))
    assert out_bf.dtype == jnp.bfloat16
    assert jnp.allclose(out_bf.astype(jnp.float32), ref, atol=1e-2, rtol=1e-2)

    print("KERNEL_OK")
</pallas_src>

<mosaic_0001>
module attributes {stable_mosaic.version = 11 : i64} {
  func.func @_embeddings_kernel(%arg0: i32, %arg1: memref<8x96xf32, #tpu.memory_space<vmem>>, %arg2: memref<96x32xf32, #tpu.memory_space<vmem>>, %arg3: memref<1x32xf32, #tpu.memory_space<vmem>>, %arg4: memref<8x32xf32, #tpu.memory_space<vmem>>) attributes {dimension_semantics = [#tpu.dimension_semantics<parallel>], iteration_bounds = array<i64: 1>, scalar_prefetch = 0 : i64, scratch_operands = 0 : i64, tpu.core_type = #tpu.core_type<tc>, window_params = [{transform_indices = @transform_0, window_bounds = array<i64: 8, 96>}, {pipeline_mode = #tpu.pipeline_mode<synchronous>, transform_indices = @transform_1, window_bounds = array<i64: 96, 32>}, {pipeline_mode = #tpu.pipeline_mode<synchronous>, transform_indices = @transform_2, window_bounds = array<i64: 1, 32>}, {transform_indices = @transform_3, window_bounds = array<i64: 8, 32>}]} {
    %c0 = arith.constant 0 : index
    %c0_0 = arith.constant 0 : index
    %0 = vector.load %arg1[%c0, %c0_0] : memref<8x96xf32, #tpu.memory_space<vmem>>, vector<8x96xf32>
    %c0_1 = arith.constant 0 : index
    %c0_2 = arith.constant 0 : index
    %1 = vector.load %arg2[%c0_1, %c0_2] : memref<96x32xf32, #tpu.memory_space<vmem>>, vector<96x32xf32>
    %cst = arith.constant dense<0.000000e+00> : vector<8x32xf32>
    %2 = tpu.matmul %0, %1, %cst {dimension_numbers = #tpu.dot_dimension_numbers<[1], [0], [0], [1], [0, 0, 1, 1], [], []>} : vector<8x96xf32>, vector<96x32xf32>, vector<8x32xf32> -> vector<8x32xf32>
    %c0_3 = arith.constant 0 : index
    %c0_4 = arith.constant 0 : index
    %3 = vector.load %arg3[%c0_3, %c0_4] : memref<1x32xf32, #tpu.memory_space<vmem>>, vector<1x32xf32>
    %4 = vector.broadcast %3 : vector<1x32xf32> to vector<8x32xf32>
    %5 = arith.addf %2, %4 : vector<8x32xf32>
    %c0_5 = arith.constant 0 : index
    %c0_6 = arith.constant 0 : index
    %6 = vector.load %arg4[%c0_5, %c0_6] : memref<8x32xf32, #tpu.memory_space<vmem>>, vector<8x32xf32>
    tpu.vector_store %arg4[%c0_5, %c0_6], %5 {strides = array<i32>} : memref<8x32xf32, #tpu.memory_space<vmem>>, vector<8x32xf32>,
    return
  }
  func.func @transform_0(%arg0: i32) -> (i32, i32) {
    %c0_i32 = arith.constant 0 : i32
    %c0_i32_0 = arith.constant 0 : i32
    return %arg0, %c0_i32 : i32, i32
  }
  func.func @transform_1(%arg0: i32) -> (i32, i32) {
    %c0_i32 = arith.constant 0 : i32
    %c0_i32_0 = arith.constant 0 : i32
    %c0_i32_1 = arith.constant 0 : i32
    return %c0_i32, %c0_i32_0 : i32, i32
  }
  func.func @transform_2(%arg0: i32) -> (i32, i32) {
    %c0_i32 = arith.constant 0 : i32
    %c0_i32_0 = arith.constant 0 : i32
    %c0_i32_1 = arith.constant 0 : i32
    return %c0_i32, %c0_i32_0 : i32, i32
  }
  func.func @transform_3(%arg0: i32) -> (i32, i32) {
    %c0_i32 = arith.constant 0 : i32
    %c0_i32_0 = arith.constant 0 : i32
    return %arg0, %c0_i32 : i32, i32
  }
}

</mosaic_0001>

<bundles_post_ra>
// kernel: tpu_custom_call.1
= control target key start
LH: loop header
LB: loop body
LE: loop exit
PB: predicated region body
PF: predicated region fallthrough
CT: control target
= control target key end

     0   :  { %v213_v3 = vmov 0.0|0.0   ;;  %vm214_vm0 = vmmov 0   ;;  %v215_v6 = vmov 0.0   ;;  %s291_s0 = inlined_call_operand.vmem [shape: f32[8,96], index: 0, kind: input, shape index: {}]   ;;  %s292_s1 = inlined_call_operand.vmem [shape: f32[96,32], index: 1, kind: input, shape index: {}]   ;;  %s293_s2 = inlined_call_operand.vmem [shape: f32[1,32], index: 2, kind: input, shape index: {}]   ;;  %s294_s3 = inlined_call_operand.hbm [shape: f32[8,32], index: 3, kind: output, shape index: {}]  }
   0x1   :  { %v16_v0 = vld [vmem:[%s292_s1] sm:$0xff]  ;;  %v17_v1 = vld [vmem:[%s292_s1 + $0x8] sm:$0xff]  ;;  %v18_v2 = vld [vmem:[%s292_s1 + $0x10] sm:$0xff]  ;;  %167 = vmatprep.subr.bf16.mxu0 %v213_v3  ;;  %164 = vmatprep.mubr.msk.f32.mxu0 %vm214_vm0, %v215_v6 }
   0x2   :  { %v168_v4 = vpack.c.bf16 %v17_v1, %v16_v0  ;;  %v19_v5 = vld [vmem:[%s292_s1 + $0x18] sm:$0xff]  ;;  %v20_v8 = vld [vmem:[%s292_s1 + $0x20] sm:$0xff]  ;;  %v21_v9 = vld [vmem:[%s292_s1 + $0x28] sm:$0xff] }
   0x3   :  { %v171_v7 = vpack.c.bf16 %v19_v5, %v18_v2 }
   0x4   :  { %169 = vmatpush3.bf16.msra.mxu0 %v168_v4 }
   0x5   :  { %170 = vmatprep.subr.bf16.mxu0 %v213_v3 }
   0x6   :  { %8 = vsyncpa [#allocation3], 0  ;;  %v174_v10 = vpack.c.bf16 %v21_v9, %v20_v8  ;;  %v22_v11 = vld [vmem:[%s292_s1 + $0x30] sm:$0xff]  ;;  %v23_v12 = vld [vmem:[%s292_s1 + $0x38] sm:$0xff]  ;;  %vm35_vm1 = vcmask 785408   ;;  %s216_s13 = smov [#allocation2]  }
   0x7   :  { %v177_v13 = vpack.c.bf16 %v23_v12, %v22_v11  ;;  %v24_v14 = vld [vmem:[%s292_s1 + $0x40] sm:$0xff]  ;;  %v25_v15 = vld [vmem:[%s292_s1 + $0x48] sm:$0xff]  ;;  %v26_v17 = vld [vmem:[%s292_s1 + $0x50] sm:$0xff]  ;;  %s117_s14 = sshll.u32 %s216_s13, 4  ;;  %vm109_vm2 = vcmask 261120   ;;  %s118_s14 = int_to_ptr.vmem [resolvable:$true] %s117_s14 }
   0x8   :  { %172 = vmatpush3.bf16.msra.mxu0 %v171_v7  ;;  %v180_v16 = vpack.c.bf16 %v25_v15, %v24_v14  ;;  %v27_v18 = vld [vmem:[%s292_s1 + $0x58] sm:$0xff]  ;;  %v15_v20 = vld [vmem:[%s291_s0] sm:$0xff]  ;;  %s189_s1 = scalar_lea.vmem %s118_s14, 128  ;;  %p194_p1 = scmp.lt.s32.totalorder %s118_s14, %s118_s14 }
   0x9   :  { %173 = vmatprep.subr.bf16.mxu0 %v213_v3  ;;  %v183_v19 = vpack.c.bf16 %v27_v18, %v26_v17  ;;  %v125_v21 = vld [vmem:[%s293_s2] ss:$0 sm:$0xff]  ;;  %p190_p0 = scmp.ne.s32.totalorder %s118_s14, %s189_s1  ;;  %p195_p2 = scmp.lt.s32.totalorder %s189_s1, %s189_s1 }
   0xb   :  { %p196_p3 = por %p195_p2, %p194_p1 }
   0xc   :  { %175 = vmatpush3.bf16.msra.mxu0 %v174_v10 }
   0xd   :  { %176 = vmatprep.subr.bf16.mxu0 %v213_v3  ;;  %p197_p4 = pnand %p196_p3, %p190_p0 }
  0x10   :  { %178 = vmatpush3.bf16.msra.mxu0 %v177_v13 }
  0x11   :  { %179 = vmatprep.subr.bf16.mxu0 %v213_v3 }
  0x14   :  { %181 = vmatpush3.bf16.msra.mxu0 %v180_v16 }
  0x15   :  { %182 = vmatprep.subr.bf16.mxu0 %v213_v3 }
  0x18   :  { %184 = vmatpush3.bf16.msra.mxu0 %v183_v19 }
  0x1b   :  { %165 = vmatmul.mubr.msk.f32.vlgmr.msra.gmra.mrb[0].mxu0 %vm35_vm1, %v15_v20 }
  0xee   :  { %v105_v22 = vpop.f32.mrb[0].mxu0 }
  0xef   :  { %v106_v23 = vadd.f32 %v125_v21, %v105_v22  ;;  %v166_v24 = vpop.f32.mrb[1].mxu0 }
  0xf1   :  { %110 = vst.msk [vmem:[#allocation2] sm:$0xff] %vm109_vm2, %v106_v23 }
  0xf2   :  { %200 = shalt.err (!%p197_p4)
}
  0xf3   :  { %s201_s16 = scalar_lea.hbm %s294_s3, 128 }
  0xf4   :  { %p202_p5 = scmp.ne.s32.totalorder %s294_s3, %s201_s16  ;;  %p205_p6 = scmp.lt.u32.totalorder %s201_s16, %s294_s3 }
  0xf6   :  { %p207_p7 = pnand %p205_p6, %p202_p5 }
  0xf8   :  { %210 = shalt.err (!%p207_p7)
}
  0xf9   :  { %120 = dma.vmem_to_hbm [thread:$0]  %s118_s14, 128, %s294_s3, [#allocation3]  }
  0xfa   :  { %211 = dma.done.wait [#allocation3], 128  }
  0xfb   :  { %212 = vsyncadd [#allocation3], 4294967168 }
  0xfc   :  { %124 = vsyncpa [#allocation3], 1 }

</bundles_post_ra>
